<compile_context>
chip_gen: v7x
topology: tpu7x:2x2x1
jax: 0.10.0
libtpu: 0.0.40
codegen_flags: <defaults>
</compile_context>

<pallas_src>
import functools

import jax
import jax.numpy as jnp
from jax.experimental import pallas as pl
from jax.experimental.pallas import tpu as pltpu


# ----------------------------- Pallas kernel ---------------------------------

def _softplus(x):
    # numerically stable softplus (matches F.softplus within fp32 tolerance)
    return jnp.maximum(x, 0.0) + jnp.log1p(jnp.exp(-jnp.abs(x)))


def bayesian_kernel(cen_ref, ctx_ref, msk_sg_ref, mu_all_ref,
                    w1a_t_ref, w1b_blk_ref, b1_t_ref,
                    mmask_ref, istack_ref, tpost_ref, sseg_ref,
                    wmd_ref, bmd_ref,
                    out_ref, *, D, W, B, TB, margin):
    f32 = jnp.float32
    eps = 1e-8
    Df = float(D)
    K = 2 * W + 1   # [center | pos_1..W | neg_1..W]

    cen = cen_ref[...]            # [TB, D]       posterior embedding of center words
    ctx = ctx_ref[...]            # [TB, W*D]     lane-packed positive-context embeddings
    msk_sg = msk_sg_ref[...]      # [TB, 3W+1]    [ mask (W) | raw prior sigmas (2W+1) ]
    mu_all = mu_all_ref[...]      # [TB, K*D]     lane-packed prior mus for center|pos|neg

    mask = msk_sg[:, :W]          # [TB, W]
    sg_raw = msk_sg[:, W:]        # [TB, K]

    # ---- posterior network (lane-dense; W/D reductions go through the MXU) ----
    # relu(Linear(cat[center, context])) for all W contexts at once:
    h = jnp.dot(ctx, w1b_blk_ref[...], preferred_element_type=f32)       # [TB, W*H]
    h = h + jnp.dot(cen, w1a_t_ref[...], preferred_element_type=f32)
    h = jnp.maximum(h + b1_t_ref[...], 0.0)                              # [TB, W*H]

    # masked sum over W as a stacked-identity matmul (MXU, not XLU)
    mask_exp = jnp.dot(mask, mmask_ref[...], preferred_element_type=f32)  # [TB, W*H]
    h_sum = jnp.dot(h * mask_exp, istack_ref[...],
                    preferred_element_type=f32)                           # [TB, H]

    # fused mean/sigma head: [H, D+1] -> mu (D cols) and raw sigma (1 col)
    md = jnp.dot(h_sum, wmd_ref[...], preferred_element_type=f32) + bmd_ref[...]
    mu_post = md[:, :D]                                                   # [TB, D]
    sig_post = _softplus(md[:, D:D + 1])                                  # [TB, 1]

    # EUP reciprocals: divides rewritten as multiplies.
    # (approx=True is a further option at a relaxed ~1e-2 tolerance.)
    inv_post = pl.reciprocal(sig_post, approx=False)                      # [TB, 1]
    sig_all = _softplus(sg_raw)                                           # [TB, K]
    inv_all = pl.reciprocal(sig_all, approx=False)                        # [TB, K]

    # ---- KL(posterior || prior_k) for all K priors in one lane-dense pass ----
    mu_post_t = jnp.dot(mu_post, tpost_ref[...],
                        preferred_element_type=f32)                       # [TB, K*D]
    diff = mu_all - mu_post_t                                             # [TB, K*D]
    ips = jnp.dot(diff * diff, sseg_ref[...],
                  preferred_element_type=f32)                             # [TB, K]

    kl = 0.5 * (Df * (jnp.log(sig_all * inv_post + eps) - 1.0 + sig_post * inv_all)
                + ips * inv_all)                                          # [TB, K]
    kl_cen = kl[:, 0:1]                                                   # [TB, 1]
    kl_pos = kl[:, 1:1 + W]                                               # [TB, W]
    kl_neg = kl[:, 1 + W:]                                                # [TB, W]

    # ---- hinge loss + per-tile partial reduction ----
    hinge = jnp.maximum(kl_pos - kl_neg + margin, 0.0)                    # [TB, W]

    # batch-padding rows (global row index >= B) contribute zero; no `valid` input
    row = jax.lax.broadcasted_iota(jnp.int32, (TB, 1), 0) + pl.program_id(0) * TB
    valid = (row < B).astype(f32)                                         # [TB, 1]

    per_ex = valid * (kl_cen + jnp.sum(mask * hinge, axis=1, keepdims=True))
    partial = jnp.sum(per_ex)
    # lane-dense per-tile partial (only [0,0,0] is read back); grid axis stays parallel
    out_ref[...] = jnp.full(out_ref.shape, partial, dtype=f32)


# ----------------------------- JAX wrapper ------------------------------------

def init_params(key, v_dim, d_dim, h_dim, pad_index):
    ks = jax.random.split(key, 8)
    f32 = jnp.float32
    scale = 0.1
    emb_post = scale * jax.random.normal(ks[0], (v_dim, d_dim), f32)
    mu_prior = scale * jax.random.normal(ks[1], (v_dim, d_dim), f32)
    sg_prior = scale * jax.random.normal(ks[2], (v_dim, 1), f32)
    # padding_idx rows are zero (nn.Embedding(padding_idx=...))
    emb_post = emb_post.at[pad_index].set(0.0)
    mu_prior = mu_prior.at[pad_index].set(0.0)
    sg_prior = sg_prior.at[pad_index].set(0.0)

    w1a = scale * jax.random.normal(ks[3], (d_dim, h_dim), f32)   # center half of Linear(2d, h)
    w1b = scale * jax.random.normal(ks[4], (d_dim, h_dim), f32)   # context half of Linear(2d, h)
    b1 = scale * jax.random.normal(ks[5], (1, h_dim), f32)
    wm = scale * jax.random.normal(ks[6], (h_dim, d_dim), f32)
    bm = scale * jax.random.normal(ks[7], (1, d_dim), f32)
    ws = scale * jax.random.normal(jax.random.fold_in(key, 99), (h_dim, 1), f32)
    bs = scale * jax.random.normal(jax.random.fold_in(key, 100), (1, 1), f32)
    return dict(emb_post=emb_post, mu_prior=mu_prior, sg_prior=sg_prior,
                w1a=w1a, w1b=w1b, b1=b1, wm=wm, bm=bm, ws=ws, bs=bs)


def bayesian_forward(params, center, pos_c, neg_c, mask, margin=1.0, batch_tile=512):
    B = center.shape[0]
    W = pos_c.shape[1]
    D = params["emb_post"].shape[1]
    H = params["w1a"].shape[1]
    K = 2 * W + 1
    f32 = jnp.float32

    # ---- glue: embedding / prior gathers (sparse nn.Embedding lookups), packed ----
    # TODO(synk): fuse into the kernel (scalar-prefetch indices + coalesced
    # make_async_copy from pl.ANY refs) to roughly halve HBM traffic.
    cen_emb = jnp.take(params["emb_post"], center, axis=0)                     # [B, D]
    ctx_emb = jnp.take(params["emb_post"], pos_c, axis=0).reshape(B, W * D)    # [B, W*D]
    all_idx = jnp.concatenate([center[:, None], pos_c, neg_c], axis=1)         # [B, K]
    mu_all = jnp.take(params["mu_prior"], all_idx, axis=0).reshape(B, K * D)   # [B, K*D]
    sg_all = jnp.take(params["sg_prior"], all_idx, axis=0)[..., 0]             # [B, K]

    # skinny per-row tensors packed into a single block: [mask | raw prior sigmas]
    msk_sg = jnp.concatenate([mask.astype(f32), sg_all], axis=1)               # [B, 3W+1]

    # ---- constant matrices: tiling / segmented reductions routed through the MXU ----
    eyeW = jnp.eye(W, dtype=f32)
    eyeH = jnp.eye(H, dtype=f32)
    eyeD = jnp.eye(D, dtype=f32)
    w1a_t = jnp.tile(params["w1a"], (1, W))                        # [D, W*H]
    w1b_blk = jnp.kron(eyeW, params["w1b"])                        # [W*D, W*H] block-diag
    b1_t = jnp.tile(params["b1"], (1, W))                          # [1, W*H]
    mmask = jnp.kron(eyeW, jnp.ones((1, H), f32))                  # [W, W*H] mask expander
    istack = jnp.kron(jnp.ones((W, 1), f32), eyeH)                 # [W*H, H] sum over W
    tpost = jnp.kron(jnp.ones((1, K), f32), eyeD)                  # [D, K*D] mu_post tiler
    sseg = jnp.kron(jnp.eye(K, dtype=f32), jnp.ones((D, 1), f32))  # [K*D, K] sum over D
    wmd = jnp.concatenate([params["wm"], params["ws"]], axis=1)    # [H, D+1] fused head
    bmd = jnp.concatenate([params["bm"], params["bs"]], axis=1)    # [1, D+1]

    # ---- batch tiling (sublane-aligned TB; even #tiles so both v7x TCs get work) ----
    TB = min(int(batch_tile), ((B + 7) // 8) * 8)
    TB = max(8, (TB // 8) * 8)
    num_tiles = -(-B // TB)
    if num_tiles > 1 and num_tiles % 2 == 1:
        num_tiles += 1
    B_pad = num_tiles * TB

    def padb(x):
        if B_pad == B:
            return x
        return jnp.pad(x, [(0, B_pad - B)] + [(0, 0)] * (x.ndim - 1))

    cen_emb, ctx_emb, msk_sg, mu_all = (padb(cen_emb), padb(ctx_emb),
                                        padb(msk_sg), padb(mu_all))

    kernel = functools.partial(bayesian_kernel, D=D, W=W, B=B, TB=TB,
                               margin=float(margin))

    row_map = lambda i: (i, 0)
    const_map = lambda i: (0, 0)

    in_specs = [
        pl.BlockSpec((TB, D), row_map),             # cen_emb
        pl.BlockSpec((TB, W * D), row_map),         # ctx_emb (lane-packed)
        pl.BlockSpec((TB, 3 * W + 1), row_map),     # mask | prior sigmas (packed)
        pl.BlockSpec((TB, K * D), row_map),         # prior mus (lane-packed)
        pl.BlockSpec((D, W * H), const_map),        # w1a tiled
        pl.BlockSpec((W * D, W * H), const_map),    # w1b block-diagonal
        pl.BlockSpec((1, W * H), const_map),        # b1 tiled
        pl.BlockSpec((W, W * H), const_map),        # mask -> W*H expander
        pl.BlockSpec((W * H, H), const_map),        # stacked identity (sum over W)
        pl.BlockSpec((D, K * D), const_map),        # mu_post tiler
        pl.BlockSpec((K * D, K), const_map),        # segmented-sum matrix (sum over D)
        pl.BlockSpec((H, D + 1), const_map),        # fused mean|sigma head
        pl.BlockSpec((1, D + 1), const_map),        # fused head bias
    ]
    out_spec = pl.BlockSpec((1, 8, 128), lambda i: (i, 0, 0))

    partials = pl.pallas_call(
        kernel,
        out_shape=jax.ShapeDtypeStruct((num_tiles, 8, 128), f32),
        grid=(num_tiles,),
        in_specs=in_specs,
        out_specs=out_spec,
        compiler_params=pltpu.CompilerParams(
            dimension_semantics=("parallel",),
            vmem_limit_bytes=48 * 1024 * 1024),
    )(cen_emb, ctx_emb, msk_sg, mu_all,
      w1a_t, w1b_blk, b1_t, mmask, istack, tpost, sseg, wmd, bmd)

    # per-tile partial sums -> final mean over the (unpadded) batch
    return jnp.sum(partials[:, 0, 0]) / float(B)


# pure-JAX reference (mirrors the PyTorch forward) for a correctness check
def bayesian_forward_ref(params, center, pos_c, neg_c, mask, margin=1.0):
    def sp(x):
        return jnp.maximum(x, 0.0) + jnp.log1p(jnp.exp(-jnp.abs(x)))

    B = center.shape[0]
    W = pos_c.shape[1]
    D = params["emb_post"].shape[1]
    cen = jnp.take(params["emb_post"], center, axis=0)
    ctx = jnp.take(params["emb_post"], pos_c, axis=0)
    x = jnp.concatenate(
        [jnp.broadcast_to(cen[:, None, :], (B, W, D)).reshape(-1, D),
         ctx.reshape(-1, D)], axis=1)
    w1 = jnp.concatenate([params["w1a"], params["w1b"]], axis=0)
    h = jax.nn.relu(x @ w1 + params["b1"]).reshape(B, W, -1)
    h_sum = jnp.sum(h * mask.astype(jnp.float32)[:, :, None], axis=1)
    mu_post = h_sum @ params["wm"] + params["bm"]
    sig_post = sp(h_sum @ params["ws"] + params["bs"])

    mu_pc = jnp.take(params["mu_prior"], center, axis=0)
    sig_pc = sp(jnp.take(params["sg_prior"], center, axis=0))
    mu_pp = jnp.take(params["mu_prior"], pos_c, axis=0)
    sig_pp = sp(jnp.take(params["sg_prior"], pos_c, axis=0)[..., 0])
    mu_pn = jnp.take(params["mu_prior"], neg_c, axis=0)
    sig_pn = sp(jnp.take(params["sg_prior"], neg_c, axis=0)[..., 0])

    def kl(mu1, s1, mu2, s2):
        diff = mu2 - mu1
        ips2 = jnp.sum(diff * diff, axis=-1)
        return 0.5 * (D * (jnp.log(s2 / s1 + 1e-8) - 1.0 + s1 / s2) + ips2 / s2)

    kl_cen = kl(mu_post[:, None, :], sig_post, mu_pc[:, None, :], sig_pc)[:, 0]
    kl_pos = kl(mu_post[:, None, :], sig_post, mu_pp, sig_pp)
    kl_neg = kl(mu_post[:, None, :], sig_post, mu_pn, sig_pn)
    loss = jnp.sum(kl_cen + jnp.sum(mask.astype(jnp.float32)
                                    * jax.nn.relu(kl_pos - kl_neg + margin), axis=1)) / B
    return loss


if __name__ == "__main__":
    V_DIM, D_DIM, H_DIM, PAD = 64, 32, 32, 0
    B, W = 4, 8

    key = jax.random.PRNGKey(0)
    params = init_params(key, V_DIM, D_DIM, H_DIM, PAD)

    k1, k2, k3, k4 = jax.random.split(jax.random.fold_in(key, 7), 4)
    center = jax.random.randint(k1, (B,), 1, V_DIM, dtype=jnp.int32)
    pos_c = jax.random.randint(k2, (B, W), 0, V_DIM, dtype=jnp.int32)
    neg_c = jax.random.randint(k3, (B, W), 1, V_DIM, dtype=jnp.int32)
    # mask: 1 where context index is not <pad>, like the data pipeline would produce
    mask = (pos_c != PAD).astype(jnp.float32)

    loss = jax.block_until_ready(bayesian_forward(params, center, pos_c, neg_c, mask))
    loss_ref = jax.block_until_ready(
        bayesian_forward_ref(params, center, pos_c, neg_c, mask))

    assert jnp.isfinite(loss), "kernel produced non-finite loss"
    assert jnp.allclose(loss, loss_ref, rtol=1e-3, atol=1e-3), (loss, loss_ref)
    print("KERNEL_OK")
</pallas_src>

<mosaic_0001>
module attributes {stable_mosaic.version = 11 : i64} {
  func.func @bayesian_kernel(%arg0: i32, %arg1: memref<8x32xf32, #tpu.memory_space<vmem>>, %arg2: memref<8x256xf32, #tpu.memory_space<vmem>>, %arg3: memref<8x25xf32, #tpu.memory_space<vmem>>, %arg4: memref<8x544xf32, #tpu.memory_space<vmem>>, %arg5: memref<32x256xf32, #tpu.memory_space<vmem>>, %arg6: memref<256x256xf32, #tpu.memory_space<vmem>>, %arg7: memref<1x256xf32, #tpu.memory_space<vmem>>, %arg8: memref<8x256xf32, #tpu.memory_space<vmem>>, %arg9: memref<256x32xf32, #tpu.memory_space<vmem>>, %arg10: memref<32x544xf32, #tpu.memory_space<vmem>>, %arg11: memref<544x17xf32, #tpu.memory_space<vmem>>, %arg12: memref<32x33xf32, #tpu.memory_space<vmem>>, %arg13: memref<1x33xf32, #tpu.memory_space<vmem>>, %arg14: memref<1x8x128xf32, #tpu.memory_space<vmem>>) attributes {dimension_semantics = [#tpu.dimension_semantics<parallel>], iteration_bounds = array<i64: 1>, scalar_prefetch = 0 : i64, scratch_operands = 0 : i64, tpu.core_type = #tpu.core_type<tc>, window_params = [{transform_indices = @transform_0, window_bounds = array<i64: 8, 32>}, {transform_indices = @transform_1, window_bounds = array<i64: 8, 256>}, {transform_indices = @transform_2, window_bounds = array<i64: 8, 25>}, {transform_indices = @transform_3, window_bounds = array<i64: 8, 544>}, {pipeline_mode = #tpu.pipeline_mode<synchronous>, transform_indices = @transform_4, window_bounds = array<i64: 32, 256>}, {pipeline_mode = #tpu.pipeline_mode<synchronous>, transform_indices = @transform_5, window_bounds = array<i64: 256, 256>}, {pipeline_mode = #tpu.pipeline_mode<synchronous>, transform_indices = @transform_6, window_bounds = array<i64: 1, 256>}, {pipeline_mode = #tpu.pipeline_mode<synchronous>, transform_indices = @transform_7, window_bounds = array<i64: 8, 256>}, {pipeline_mode = #tpu.pipeline_mode<synchronous>, transform_indices = @transform_8, window_bounds = array<i64: 256, 32>}, {pipeline_mode = #tpu.pipeline_mode<synchronous>, transform_indices = @transform_9, window_bounds = array<i64: 32, 544>}, {pipeline_mode = #tpu.pipeline_mode<synchronous>, transform_indices = @transform_10, window_bounds = array<i64: 544, 17>}, {pipeline_mode = #tpu.pipeline_mode<synchronous>, transform_indices = @transform_11, window_bounds = array<i64: 32, 33>}, {pipeline_mode = #tpu.pipeline_mode<synchronous>, transform_indices = @transform_12, window_bounds = array<i64: 1, 33>}, {transform_indices = @transform_13, window_bounds = array<i64: 1, 8, 128>}]} {
    %c0 = arith.constant 0 : index
    %c0_0 = arith.constant 0 : index
    %0 = vector.load %arg1[%c0, %c0_0] : memref<8x32xf32, #tpu.memory_space<vmem>>, vector<8x32xf32>
    %c0_1 = arith.constant 0 : index
    %c0_2 = arith.constant 0 : index
    %1 = vector.load %arg2[%c0_1, %c0_2] : memref<8x256xf32, #tpu.memory_space<vmem>>, vector<8x256xf32>
    %c0_3 = arith.constant 0 : index
    %c0_4 = arith.constant 0 : index
    %2 = vector.load %arg3[%c0_3, %c0_4] : memref<8x25xf32, #tpu.memory_space<vmem>>, vector<8x25xf32>
    %c0_5 = arith.constant 0 : index
    %c0_6 = arith.constant 0 : index
    %3 = vector.load %arg4[%c0_5, %c0_6] : memref<8x544xf32, #tpu.memory_space<vmem>>, vector<8x544xf32>
    %4 = vector.extract_strided_slice %2 {offsets = [0, 0], sizes = [8, 8], strides = [1, 1]} : vector<8x25xf32> to vector<8x8xf32>
    %5 = vector.extract_strided_slice %2 {offsets = [0, 8], sizes = [8, 17], strides = [1, 1]} : vector<8x25xf32> to vector<8x17xf32>
    %c0_7 = arith.constant 0 : index
    %c0_8 = arith.constant 0 : index
    %6 = vector.load %arg6[%c0_7, %c0_8] : memref<256x256xf32, #tpu.memory_space<vmem>>, vector<256x256xf32>
    %cst = arith.constant dense<0.000000e+00> : vector<8x256xf32>
    %7 = tpu.matmul %1, %6, %cst {dimension_numbers = #tpu.dot_dimension_numbers<[1], [0], [0], [1], [0, 0, 1, 1], [], []>} : vector<8x256xf32>, vector<256x256xf32>, vector<8x256xf32> -> vector<8x256xf32>
    %c0_9 = arith.constant 0 : index
    %c0_10 = arith.constant 0 : index
    %8 = vector.load %arg5[%c0_9, %c0_10] : memref<32x256xf32, #tpu.memory_space<vmem>>, vector<32x256xf32>
    %cst_11 = arith.constant dense<0.000000e+00> : vector<8x256xf32>
    %9 = tpu.matmul %0, %8, %cst_11 {dimension_numbers = #tpu.dot_dimension_numbers<[1], [0], [0], [1], [0, 0, 1, 1], [], []>} : vector<8x32xf32>, vector<32x256xf32>, vector<8x256xf32> -> vector<8x256xf32>
    %10 = arith.addf %7, %9 : vector<8x256xf32>
    %c0_12 = arith.constant 0 : index
    %c0_13 = arith.constant 0 : index
    %11 = vector.load %arg7[%c0_12, %c0_13] : memref<1x256xf32, #tpu.memory_space<vmem>>, vector<1x256xf32>
    %12 = vector.broadcast %11 : vector<1x256xf32> to vector<8x256xf32>
    %13 = arith.addf %10, %12 : vector<8x256xf32>
    %cst_14 = arith.constant 0.000000e+00 : f32
    %14 = vector.broadcast %cst_14 : f32 to vector<8x256xf32>
    %15 = arith.maximumf %13, %14 : vector<8x256xf32>
    %c0_15 = arith.constant 0 : index
    %c0_16 = arith.constant 0 : index
    %16 = vector.load %arg8[%c0_15, %c0_16] : memref<8x256xf32, #tpu.memory_space<vmem>>, vector<8x256xf32>
    %cst_17 = arith.constant dense<0.000000e+00> : vector<8x256xf32>
    %17 = tpu.matmul %4, %16, %cst_17 {dimension_numbers = #tpu.dot_dimension_numbers<[1], [0], [0], [1], [0, 0, 1, 1], [], []>} : vector<8x8xf32>, vector<8x256xf32>, vector<8x256xf32> -> vector<8x256xf32>
    %18 = arith.mulf %15, %17 : vector<8x256xf32>
    %c0_18 = arith.constant 0 : index
    %c0_19 = arith.constant 0 : index
    %19 = vector.load %arg9[%c0_18, %c0_19] : memref<256x32xf32, #tpu.memory_space<vmem>>, vector<256x32xf32>
    %cst_20 = arith.constant dense<0.000000e+00> : vector<8x32xf32>
    %20 = tpu.matmul %18, %19, %cst_20 {dimension_numbers = #tpu.dot_dimension_numbers<[1], [0], [0], [1], [0, 0, 1, 1], [], []>} : vector<8x256xf32>, vector<256x32xf32>, vector<8x32xf32> -> vector<8x32xf32>
    %c0_21 = arith.constant 0 : index
    %c0_22 = arith.constant 0 : index
    %21 = vector.load %arg12[%c0_21, %c0_22] : memref<32x33xf32, #tpu.memory_space<vmem>>, vector<32x33xf32>
    %cst_23 = arith.constant dense<0.000000e+00> : vector<8x33xf32>
    %22 = tpu.matmul %20, %21, %cst_23 {dimension_numbers = #tpu.dot_dimension_numbers<[1], [0], [0], [1], [0, 0, 1, 1], [], []>} : vector<8x32xf32>, vector<32x33xf32>, vector<8x33xf32> -> vector<8x33xf32>
    %c0_24 = arith.constant 0 : index
    %c0_25 = arith.constant 0 : index
    %23 = vector.load %arg13[%c0_24, %c0_25] : memref<1x33xf32, #tpu.memory_space<vmem>>, vector<1x33xf32>
    %24 = vector.broadcast %23 : vector<1x33xf32> to vector<8x33xf32>
    %25 = arith.addf %22, %24 : vector<8x33xf32>
    %26 = vector.extract_strided_slice %25 {offsets = [0, 0], sizes = [8, 32], strides = [1, 1]} : vector<8x33xf32> to vector<8x32xf32>
    %27 = vector.extract_strided_slice %25 {offsets = [0, 32], sizes = [8, 1], strides = [1, 1]} : vector<8x33xf32> to vector<8x1xf32>
    %cst_26 = arith.constant 0.000000e+00 : f32
    %28 = vector.broadcast %cst_26 : f32 to vector<8x1xf32>
    %29 = arith.maximumf %27, %28 : vector<8x1xf32>
    %30 = math.absf %27 : vector<8x1xf32>
    %cst_27 = arith.constant 0.000000e+00 : f32
    %31 = vector.broadcast %cst_27 : f32 to vector<8x1xf32>
    %32 = arith.subf %31, %30 : vector<8x1xf32>
    %33 = math.exp %32 : vector<8x1xf32>
    %34 = math.log1p %33 : vector<8x1xf32>
    %35 = arith.addf %29, %34 : vector<8x1xf32>
    %36 = tpu.reciprocal %35 : vector<8x1xf32> -> vector<8x1xf32>
    %cst_28 = arith.constant 0.000000e+00 : f32
    %37 = vector.broadcast %cst_28 : f32 to vector<8x17xf32>
    %38 = arith.maximumf %5, %37 : vector<8x17xf32>
    %39 = math.absf %5 : vector<8x17xf32>
    %cst_29 = arith.constant 0.000000e+00 : f32
    %40 = vector.broadcast %cst_29 : f32 to vector<8x17xf32>
    %41 = arith.subf %40, %39 : vector<8x17xf32>
    %42 = math.exp %41 : vector<8x17xf32>
    %43 = math.log1p %42 : vector<8x17xf32>
    %44 = arith.addf %38, %43 : vector<8x17xf32>
    %45 = tpu.reciprocal %44 : vector<8x17xf32> -> vector<8x17xf32>
    %c0_30 = arith.constant 0 : index
    %c0_31 = arith.constant 0 : index
    %46 = vector.load %arg10[%c0_30, %c0_31] : memref<32x544xf32, #tpu.memory_space<vmem>>, vector<32x544xf32>
    %cst_32 = arith.constant dense<0.000000e+00> : vector<8x544xf32>
    %47 = tpu.matmul %26, %46, %cst_32 {dimension_numbers = #tpu.dot_dimension_numbers<[1], [0], [0], [1], [0, 0, 1, 1], [], []>} : vector<8x32xf32>, vector<32x544xf32>, vector<8x544xf32> -> vector<8x544xf32>
    %48 = arith.subf %3, %47 : vector<8x544xf32>
    %49 = arith.mulf %48, %48 : vector<8x544xf32>
    %c0_33 = arith.constant 0 : index
    %c0_34 = arith.constant 0 : index
    %50 = vector.load %arg11[%c0_33, %c0_34] : memref<544x17xf32, #tpu.memory_space<vmem>>, vector<544x17xf32>
    %cst_35 = arith.constant dense<0.000000e+00> : vector<8x17xf32>
    %51 = tpu.matmul %49, %50, %cst_35 {dimension_numbers = #tpu.dot_dimension_numbers<[1], [0], [0], [1], [0, 0, 1, 1], [], []>} : vector<8x544xf32>, vector<544x17xf32>, vector<8x17xf32> -> vector<8x17xf32>
    %52 = vector.broadcast %36 : vector<8x1xf32> to vector<8x17xf32>
    %53 = arith.mulf %44, %52 : vector<8x17xf32>
    %cst_36 = arith.constant 9.99999993E-9 : f32
    %54 = vector.broadcast %cst_36 : f32 to vector<8x17xf32>
    %55 = arith.addf %53, %54 : vector<8x17xf32>
    %56 = math.log %55 : vector<8x17xf32>
    %cst_37 = arith.constant 1.000000e+00 : f32
    %57 = vector.broadcast %cst_37 : f32 to vector<8x17xf32>
    %58 = arith.subf %56, %57 : vector<8x17xf32>
    %59 = vector.broadcast %35 : vector<8x1xf32> to vector<8x17xf32>
    %60 = arith.mulf %59, %45 : vector<8x17xf32>
    %61 = arith.addf %58, %60 : vector<8x17xf32>
    %cst_38 = arith.constant 3.200000e+01 : f32
    %62 = vector.broadcast %cst_38 : f32 to vector<8x17xf32>
    %63 = arith.mulf %62, %61 : vector<8x17xf32>
    %64 = arith.mulf %51, %45 : vector<8x17xf32>
    %65 = arith.addf %63, %64 : vector<8x17xf32>
    %cst_39 = arith.constant 5.000000e-01 : f32
    %66 = vector.broadcast %cst_39 : f32 to vector<8x17xf32>
    %67 = arith.mulf %66, %65 : vector<8x17xf32>
    %68 = vector.extract_strided_slice %67 {offsets = [0, 0], sizes = [8, 1], strides = [1, 1]} : vector<8x17xf32> to vector<8x1xf32>
    %69 = vector.extract_strided_slice %67 {offsets = [0, 1], sizes = [8, 8], strides = [1, 1]} : vector<8x17xf32> to vector<8x8xf32>
    %70 = vector.extract_strided_slice %67 {offsets = [0, 9], sizes = [8, 8], strides = [1, 1]} : vector<8x17xf32> to vector<8x8xf32>
    %71 = arith.subf %69, %70 : vector<8x8xf32>
    %cst_40 = arith.constant 1.000000e+00 : f32
    %72 = vector.broadcast %cst_40 : f32 to vector<8x8xf32>
    %73 = arith.addf %71, %72 : vector<8x8xf32>
    %cst_41 = arith.constant 0.000000e+00 : f32
    %74 = vector.broadcast %cst_41 : f32 to vector<8x8xf32>
    %75 = arith.maximumf %73, %74 : vector<8x8xf32>
    %76 = tpu.iota {dimensions = array<i32: 0>} : vector<8x1xi32>
    %c8_i32 = arith.constant 8 : i32
    %77 = arith.muli %arg0, %c8_i32 : i32
    %78 = vector.broadcast %77 : i32 to vector<8x1xi32>
    %79 = arith.addi %76, %78 : vector<8x1xi32>
    %c4_i32 = arith.constant 4 : i32
    %80 = vector.broadcast %c4_i32 : i32 to vector<8x1xi32>
    %81 = arith.cmpi slt, %79, %80 : vector<8x1xi32>
    %82 = arith.extui %81 : vector<8x1xi1> to vector<8x1xi32>
    %83 = arith.sitofp %82 : vector<8x1xi32> to vector<8x1xf32>
    %84 = arith.mulf %4, %75 : vector<8x8xf32>
    %cst_42 = arith.constant dense<0.000000e+00> : vector<8xf32>
    %85 = vector.multi_reduction <add>, %84, %cst_42 [1] : vector<8x8xf32> to vector<8xf32>
    %86 = vector.shape_cast %85 : vector<8xf32> to vector<8x1xf32>
    %87 = arith.addf %68, %86 : vector<8x1xf32>
    %88 = arith.mulf %83, %87 : vector<8x1xf32>
    %89 = vector.shape_cast %88 : vector<8x1xf32> to vector<1x8x1xf32>
    %cst_43 = arith.constant dense<0.000000e+00> : vector<1xf32>
    %90 = vector.multi_reduction <add>, %89, %cst_43 [1, 2] : vector<1x8x1xf32> to vector<1xf32>
    %91 = vector.shape_cast %90 : vector<1xf32> to vector<1x1x1xf32>
    %92 = vector.extract %91[0, 0, 0] : f32 from vector<1x1x1xf32>
    %93 = vector.broadcast %92 : f32 to vector<1x8x128xf32>
    %c0_44 = arith.constant 0 : index
    %c0_45 = arith.constant 0 : index
    %c0_46 = arith.constant 0 : index
    %94 = vector.load %arg14[%c0_44, %c0_45, %c0_46] : memref<1x8x128xf32, #tpu.memory_space<vmem>>, vector<1x8x128xf32>
    tpu.vector_store %arg14[%c0_44, %c0_45, %c0_46], %93 {strides = array<i32>} : memref<1x8x128xf32, #tpu.memory_space<vmem>>, vector<1x8x128xf32>,
    return
  }
  func.func @transform_0(%arg0: i32) -> (i32, i32) {
    %c0_i32 = arith.constant 0 : i32
    %c0_i32_0 = arith.constant 0 : i32
    return %arg0, %c0_i32 : i32, i32
  }
  func.func @transform_1(%arg0: i32) -> (i32, i32) {
    %c0_i32 = arith.constant 0 : i32
    %c0_i32_0 = arith.constant 0 : i32
    return %arg0, %c0_i32 : i32, i32
  }
  func.func @transform_2(%arg0: i32) -> (i32, i32) {
    %c0_i32 = arith.constant 0 : i32
    %c0_i32_0 = arith.constant 0 : i32
    return %arg0, %c0_i32 : i32, i32
  }
  func.func @transform_3(%arg0: i32) -> (i32, i32) {
    %c0_i32 = arith.constant 0 : i32
    %c0_i32_0 = arith.constant 0 : i32
    return %arg0, %c0_i32 : i32, i32
  }
  func.func @transform_4(%arg0: i32) -> (i32, i32) {
    %c0_i32 = arith.constant 0 : i32
    %c0_i32_0 = arith.constant 0 : i32
    %c0_i32_1 = arith.constant 0 : i32
    return %c0_i32, %c0_i32_0 : i32, i32
  }
  func.func @transform_5(%arg0: i32) -> (i32, i32) {
    %c0_i32 = arith.constant 0 : i32
    %c0_i32_0 = arith.constant 0 : i32
    %c0_i32_1 = arith.constant 0 : i32
    return %c0_i32, %c0_i32_0 : i32, i32
  }
  func.func @transform_6(%arg0: i32) -> (i32, i32) {
    %c0_i32 = arith.constant 0 : i32
    %c0_i32_0 = arith.constant 0 : i32
    %c0_i32_1 = arith.constant 0 : i32
    return %c0_i32, %c0_i32_0 : i32, i32
  }
  func.func @transform_7(%arg0: i32) -> (i32, i32) {
    %c0_i32 = arith.constant 0 : i32
    %c0_i32_0 = arith.constant 0 : i32
    %c0_i32_1 = arith.constant 0 : i32
    return %c0_i32, %c0_i32_0 : i32, i32
  }
  func.func @transform_8(%arg0: i32) -> (i32, i32) {
    %c0_i32 = arith.constant 0 : i32
    %c0_i32_0 = arith.constant 0 : i32
    %c0_i32_1 = arith.constant 0 : i32
    return %c0_i32, %c0_i32_0 : i32, i32
  }
  func.func @transform_9(%arg0: i32) -> (i32, i32) {
    %c0_i32 = arith.constant 0 : i32
    %c0_i32_0 = arith.constant 0 : i32
    %c0_i32_1 = arith.constant 0 : i32
    return %c0_i32, %c0_i32_0 : i32, i32
  }
  func.func @transform_10(%arg0: i32) -> (i32, i32) {
    %c0_i32 = arith.constant 0 : i32
    %c0_i32_0 = arith.constant 0 : i32
    %c0_i32_1 = arith.constant 0 : i32
    return %c0_i32, %c0_i32_0 : i32, i32
  }
  func.func @transform_11(%arg0: i32) -> (i32, i32) {
    %c0_i32 = arith.constant 0 : i32
    %c0_i32_0 = arith.constant 0 : i32
    %c0_i32_1 = arith.constant 0 : i32
    return %c0_i32, %c0_i32_0 : i32, i32
  }
  func.func @transform_12(%arg0: i32) -> (i32, i32) {
    %c0_i32 = arith.constant 0 : i32
    %c0_i32_0 = arith.constant 0 : i32
    %c0_i32_1 = arith.constant 0 : i32
    return %c0_i32, %c0_i32_0 : i32, i32
  }
  func.func @transform_13(%arg0: i32) -> (i32, i32, i32) {
    %c0_i32 = arith.constant 0 : i32
    %c0_i32_0 = arith.constant 0 : i32
    %c0_i32_1 = arith.constant 0 : i32
    return %arg0, %c0_i32, %c0_i32_0 : i32, i32, i32
  }
}

</mosaic_0001>

<bundles_post_ra>
// kernel: tpu_custom_call.1
= control target key start
LH: loop header
LB: loop body
LE: loop exit
PB: predicated region body
PF: predicated region fallthrough
CT: control target
= control target key end

     0   :  { %v1613_v7 = vmov 0.0   ;;  %vm126_vm0 = vcmask 261120   ;;  %vm290_vm1 = vcmask 64512   ;;  %s2377_s0 = inlined_call_operand.vmem [shape: f32[8,32], index: 0, kind: input, shape index: {}]   ;;  %s2378_s1 = inlined_call_operand.vmem [shape: f32[8,256], index: 1, kind: input, shape index: {}]   ;;  %s2379_s2 = inlined_call_operand.vmem [shape: f32[8,25], index: 2, kind: input, shape index: {}]   ;;  %s2380_s3 = inlined_call_operand.vmem [shape: f32[8,544], index: 3, kind: input, shape index: {}]   ;;  %s2381_s4 = inlined_call_operand.vmem [shape: f32[32,256], index: 4, kind: input, shape index: {}]   ;;  %s2382_s5 = inlined_call_operand.vmem [shape: f32[256,256], index: 5, kind: input, shape index: {}]   ;;  %s2383_s6 = inlined_call_operand.vmem [shape: f32[1,256], index: 6, kind: input, shape index: {}]   ;;  %s2384_s7 = inlined_call_operand.vmem [shape: f32[8,256], index: 7, kind: input, shape index: {}]   ;;  %s2385_s8 = inlined_call_operand.vmem [shape: f32[256,32], index: 8, kind: input, shape index: {}]   ;;  %s2386_s9 = inlined_call_operand.vmem [shape: f32[32,544], index: 9, kind: input, shape index: {}]   ;;  %s2387_s10 = inlined_call_operand.vmem [shape: f32[544,17], index: 10, kind: input, shape index: {}]   ;;  %s2388_s11 = inlined_call_operand.vmem [shape: f32[32,33], index: 11, kind: input, shape index: {}]   ;;  %s2389_s12 = inlined_call_operand.vmem [shape: f32[1,33], index: 12, kind: input, shape index: {}]   ;;  %s2390_s13 = inlined_call_operand.hbm [shape: f32[1,8,128], index: 13, kind: output, shape index: {}]  }
   0x1   :  { %v119_v0 = vld [vmem:[%s2381_s4 + $0x8] sm:$0xff]  ;;  %v121_v1 = vld [vmem:[%s2381_s4 + $0x18] sm:$0xff]  ;;  %v118_v2 = vld [vmem:[%s2381_s4] sm:$0xff]  ;;  %194 = vmatprep.mubr.f32.mxu0 %v1613_v7  ;;  %358 = vmatprep.mubr.f32.mxu1 %v1613_v7 }
   0x2   :  { %v1359_v3 = vpack.c.bf16 %v121_v1, %v119_v0  ;;  %v120_v4 = vld [vmem:[%s2381_s4 + $0x10] sm:$0xff]  ;;  %v123_v5 = vld [vmem:[%s2381_s4 + $0x28] sm:$0xff]  ;;  %v125_v6 = vld [vmem:[%s2381_s4 + $0x38] sm:$0xff] }
   0x3   :  { %v1361_v8 = vpack.c.bf16 %v120_v4, %v118_v2  ;;  %v1363_v9 = vpack.c.bf16 %v125_v6, %v123_v5  ;;  %v122_v10 = vld [vmem:[%s2381_s4 + $0x20] sm:$0xff]  ;;  %v124_v11 = vld [vmem:[%s2381_s4 + $0x30] sm:$0xff]  ;;  %v55_v12 = vld [vmem:[%s2382_s5 + $0x8] sm:$0xff] }
   0x4   :  { %1360 = vmatprep.subr.bf16.mxu0 %v1359_v3  ;;  %v57_v13 = vld [vmem:[%s2382_s5 + $0x18] sm:$0xff]  ;;  %v1365_v14 = vpack.c.bf16 %v124_v11, %v122_v10  ;;  %v54_v16 = vld [vmem:[%s2382_s5] sm:$0xff]  ;;  %v56_v17 = vld [vmem:[%s2382_s5 + $0x10] sm:$0xff] }
   0x5   :  { %1362 = vmatpush1.bf16.msra.mxu0 %v1361_v8  ;;  %v1367_v15 = vpack.c.bf16 %v57_v13, %v55_v12  ;;  %v59_v18 = vld [vmem:[%s2382_s5 + $0x28] sm:$0xff]  ;;  %v61_v19 = vld [vmem:[%s2382_s5 + $0x38] sm:$0xff]  ;;  %v45_v20 = vld [vmem:[%s2377_s0] sm:$0xff]  ;;  %v1369_v21 = vpack.c.bf16 %v56_v17, %v54_v16 }
   0x6   :  { %1364 = vmatprep.subr.bf16.mxu0 %v1363_v9  ;;  %v1371_v22 = vpack.c.bf16 %v61_v19, %v59_v18  ;;  %v58_v23 = vld [vmem:[%s2382_s5 + $0x20] sm:$0xff]  ;;  %v60_v24 = vld [vmem:[%s2382_s5 + $0x30] sm:$0xff]  ;;  %v63_v25 = vld [vmem:[%s2382_s5 + $0x48] sm:$0xff] }
   0x7   :  { %v65_v26 = vld [vmem:[%s2382_s5 + $0x58] sm:$0xff]  ;;  %v1373_v27 = vpack.c.bf16 %v60_v24, %v58_v23  ;;  %v62_v29 = vld [vmem:[%s2382_s5 + $0x40] sm:$0xff]  ;;  %v64_v30 = vld [vmem:[%s2382_s5 + $0x50] sm:$0xff] }
   0x8   :  { %v1375_v28 = vpack.c.bf16 %v65_v26, %v63_v25  ;;  %v67_v31 = vld [vmem:[%s2382_s5 + $0x68] sm:$0xff]  ;;  %v69_v32 = vld [vmem:[%s2382_s5 + $0x78] sm:$0xff]  ;;  %v1377_v33 = vpack.c.bf16 %v64_v30, %v62_v29  ;;  %v66_v35 = vld [vmem:[%s2382_s5 + $0x60] sm:$0xff] }
   0x9   :  { %1366 = vmatpush1.bf16.msra.mxu0 %v1365_v14  ;;  %v1379_v34 = vpack.c.bf16 %v69_v32, %v67_v31  ;;  %v68_v36 = vld [vmem:[%s2382_s5 + $0x70] sm:$0xff]  ;;  %v71_v37 = vld [vmem:[%s2382_s5 + $0x88] sm:$0xff]  ;;  %v73_v38 = vld [vmem:[%s2382_s5 + $0x98] sm:$0xff] }
   0xa   :  { %1368 = vmatprep.subr.bf16.mxu0 %v1367_v15  ;;  %v1381_v39 = vpack.c.bf16 %v68_v36, %v66_v35  ;;  %v1383_v40 = vpack.c.bf16 %v73_v38, %v71_v37  ;;  %v70_v41 = vld [vmem:[%s2382_s5 + $0x80] sm:$0xff]  ;;  %v72_v42 = vld [vmem:[%s2382_s5 + $0x90] sm:$0xff]  ;;  %v75_v43 = vld [vmem:[%s2382_s5 + $0xa8] sm:$0xff] }
   0xb   :  { %v77_v44 = vld [vmem:[%s2382_s5 + $0xb8] sm:$0xff]  ;;  %v74_v45 = vld [vmem:[%s2382_s5 + $0xa0] sm:$0xff]  ;;  %v76_v46 = vld [vmem:[%s2382_s5 + $0xb0] sm:$0xff]  ;;  %v1385_v47 = vpack.c.bf16 %v72_v42, %v70_v41 }
   0xc   :  { %1196 = vmatmul.mubr.msk.f32.vlgmr.msra.gmra.mrb[0].mxu0 %vm126_vm0, %v45_v20  ;;  %v79_v48 = vld [vmem:[%s2382_s5 + $0xc8] sm:$0xff]  ;;  %v81_v49 = vld [vmem:[%s2382_s5 + $0xd8] sm:$0xff]  ;;  %v1387_v51 = vpack.c.bf16 %v77_v44, %v75_v43  ;;  %v288_v53 = vld [vmem:[%s2384_s7] sm:$0xff]  ;;  %v1389_v62 = vpack.c.bf16 %v76_v46, %v74_v45 }
   0xd   :  { %1370 = vmatpush1.bf16.msra.mxu0 %v1369_v21  ;;  %v47_v50 = vld [vmem:[%s2378_s1 + $0x8] sm:$0xff]  ;;  %v1811_v54 = vld [vmem:[%s2379_s2] sm:$0xff]  ;;  %v385_v60 = vld [vmem:[%s2385_s8 + $0x90] sm:$0xff]  ;;  %v1391_v4 = vpack.c.bf16 %v81_v49, %v79_v48 }
   0xe   :  { %1372 = vmatprep.subr.bf16.mxu0 %v1371_v22  ;;  %265 = vmatprep.mubr.f32.mxu0 %v47_v50  ;;  %v289_v52 = vld [vmem:[%s2384_s7 + $0x8] sm:$0xff]  ;;  %v383_v55 = vld [vmem:[%s2385_s8 + $0x80] sm:$0xff]  ;;  %v386_v61 = vld [vmem:[%s2385_s8 + $0x98] sm:$0xff] }
   0xf   :  { %294 = vmatprep.subr.mxu1 %v289_v52  ;;  %v384_v56 = vld [vmem:[%s2385_s8 + $0x88] sm:$0xff]  ;;  %v367_v57 = vld [vmem:[%s2385_s8] sm:$0xff]  ;;  %v1435_v0 = vpack.c.bf16 %v386_v61, %v385_v60  ;;  %v369_v1 = vld [vmem:[%s2385_s8 + $0x10] sm:$0xff] }
  0x10   :  { %295 = vmatpush1.msra.mxu1 %v288_v53  ;;  %v1431_v58 = vpack.c.bf16 %v384_v56, %v383_v55  ;;  %v368_v59 = vld [vmem:[%s2385_s8 + $0x8] sm:$0xff]  ;;  %v370_v2 = vld [vmem:[%s2385_s8 + $0x18] sm:$0xff]  ;;  %v387_v3 = vld [vmem:[%s2385_s8 + $0xa0] sm:$0xff] }
  0x11   :  { %1374 = vmatpush1.bf16.msra.mxu0 %v1373_v27  ;;  %1197 = vmatmul.mubr.msk.f32.vlgmr.msra.gmra.mrb[0].mxu1 %vm290_vm1, %v1811_v54  ;;  %v1433_v63 = vpack.c.bf16 %v368_v59, %v367_v57  ;;  %v78_v5 = vld [vmem:[%s2382_s5 + $0xc0] sm:$0xff]  ;;  %v80_v6 = vld [vmem:[%s2382_s5 + $0xd0] sm:$0xff]  ;;  %v388_v8 = vld [vmem:[%s2385_s8 + $0xa8] sm:$0xff]  ;;  %v1437_v11 = vpack.c.bf16 %v370_v2, %v369_v1 }
  0x12   :  { %1376 = vmatprep.subr.bf16.mxu0 %v1375_v28  ;;  %1432 = vmatprep.subr.bf16.mxu1 %v1431_v58  ;;  %v83_v9 = vld [vmem:[%s2382_s5 + $0xe8] sm:$0xff]  ;;  %v85_v10 = vld [vmem:[%s2382_s5 + $0xf8] sm:$0xff]  ;;  %v1439_v12 = vpack.c.bf16 %v388_v8, %v387_v3  ;;  %v371_v13 = vld [vmem:[%s2385_s8 + $0x20] sm:$0xff]  ;;  %v1393_v15 = vpack.c.bf16 %v80_v6, %v78_v5 }
  0x13   :  { %1434 = vmatpush3.bf16.msra.mxu1 %v1433_v63  ;;  %v372_v14 = vld [vmem:[%s2385_s8 + $0x28] sm:$0xff]  ;;  %v389_v16 = vld [vmem:[%s2385_s8 + $0xb0] sm:$0xff]  ;;  %v390_v17 = vld [vmem:[%s2385_s8 + $0xb8] sm:$0xff]  ;;  %v1395_v18 = vpack.c.bf16 %v85_v10, %v83_v9 }
  0x14   :  { %1436 = vmatprep.subr.bf16.mxu1 %v1435_v0  ;;  %v82_v19 = vld [vmem:[%s2382_s5 + $0xe0] sm:$0xff]  ;;  %v84_v20 = vld [vmem:[%s2382_s5 + $0xf0] sm:$0xff]  ;;  %v87_v21 = vld [vmem:[%s2382_s5 + $0x108] sm:$0xff]  ;;  %v1441_v23 = vpack.c.bf16 %v372_v14, %v371_v13 }
  0x15   :  { %1378 = vmatpush1.bf16.msra.mxu0 %v1377_v33  ;;  %v89_v22 = vld [vmem:[%s2382_s5 + $0x118] sm:$0xff] }
  0x16   :  { %1380 = vmatprep.subr.bf16.mxu0 %v1379_v34 }
  0x17   :  { %1438 = vmatpush3.bf16.msra.mxu1 %v1437_v11 }
  0x19   :  { %1382 = vmatpush1.bf16.msra.mxu0 %v1381_v39 }
  0x1a   :  { %1384 = vmatprep.subr.bf16.mxu0 %v1383_v40 }
  0x1d   :  { %1386 = vmatpush1.bf16.msra.mxu0 %v1385_v47 }
  0x1e   :  { %1388 = vmatprep.subr.bf16.mxu0 %v1387_v51 }
  0x21   :  { %1390 = vmatpush1.bf16.msra.mxu0 %v1389_v62 }
  0x22   :  { %1392 = vmatprep.subr.bf16.mxu0 %v1391_v4 }
  0x23   :  { %18 = vsyncpa [#allocation3], 0  ;;  %1440 = vmatprep.subr.bf16.mxu1 %v1439_v12  ;;  %v1443_v24 = vpack.c.bf16 %v390_v17, %v389_v16  ;;  %v373_v25 = vld [vmem:[%s2385_s8 + $0x30] sm:$0xff]  ;;  %v374_v26 = vld [vmem:[%s2385_s8 + $0x38] sm:$0xff]  ;;  %v1397_v27 = vpack.c.bf16 %v84_v20, %v82_v19  ;;  %v1399_v30 = vpack.c.bf16 %v89_v22, %v87_v21  ;;  %vm1615_vm2 = vmmov 0   ;;  %s1617_s26 = smov 120  }
  0x24   :  { %v391_v28 = vld [vmem:[%s2385_s8 + $0xc0] sm:$0xff]  ;;  %v392_v29 = vld [vmem:[%s2385_s8 + $0xc8] sm:$0xff]  ;;  %v88_v32 = vld [vmem:[%s2382_s5 + $0x110] sm:$0xff]  ;;  %1442 = vmatpush3.bf16.msra.mxu1 %v1441_v23  ;;  %v1445_v35 = vpack.c.bf16 %v374_v26, %v373_v25  ;;  %s1619_s30 = smov 119   ;;  %vm1169_vm6 = vcmask 7168   ;;  %s1620_s14 = smov [#allocation2]  }
  0x25   :  { %1394 = vmatpush1.bf16.msra.mxu0 %v1393_v15  ;;  %v86_v31 = vld [vmem:[%s2382_s5 + $0x100] sm:$0xff]  ;;  %v91_v33 = vld [vmem:[%s2382_s5 + $0x128] sm:$0xff]  ;;  %v93_v34 = vld [vmem:[%s2382_s5 + $0x138] sm:$0xff]  ;;  %1444 = vmatprep.subr.bf16.mxu1 %v1443_v24  ;;  %v1447_v36 = vpack.c.bf16 %v392_v29, %v391_v28  ;;  %s1188_s4 = sshll.u32 %s1620_s14, 4  ;;  %s1189_s4 = int_to_ptr.vmem [resolvable:$true] %s1188_s4 }
  0x26   :  { %1396 = vmatprep.subr.bf16.mxu0 %v1395_v18  ;;  %v375_v37 = vld [vmem:[%s2385_s8 + $0x40] sm:$0xff]  ;;  %v376_v38 = vld [vmem:[%s2385_s8 + $0x48] sm:$0xff]  ;;  %v1401_v39 = vpack.c.bf16 %v88_v32, %v86_v31  ;;  %v393_v40 = vld [vmem:[%s2385_s8 + $0xd0] sm:$0xff]  ;;  %v1403_v42 = vpack.c.bf16 %v93_v34, %v91_v33  ;;  %p1594_p1 = scmp.lt.s32.totalorder %s1189_s4, %s1189_s4 }
  0x27   :  { %v394_v41 = vld [vmem:[%s2385_s8 + $0xd8] sm:$0xff]  ;;  %v90_v43 = vld [vmem:[%s2382_s5 + $0x120] sm:$0xff]  ;;  %v92_v44 = vld [vmem:[%s2382_s5 + $0x130] sm:$0xff]  ;;  %v1449_v47 = vpack.c.bf16 %v376_v38, %v375_v37  ;;  %v1614_v38 = vmov 0.0|0.0  }
  0x28   :  { %v95_v45 = vld [vmem:[%s2382_s5 + $0x148] sm:$0xff]  ;;  %v97_v46 = vld [vmem:[%s2382_s5 + $0x158] sm:$0xff]  ;;  %1446 = vmatpush3.bf16.msra.mxu1 %v1445_v35  ;;  %v1451_v48 = vpack.c.bf16 %v394_v41, %v393_v40  ;;  %v377_v49 = vld [vmem:[%s2385_s8 + $0x50] sm:$0xff]  ;;  %v1405_v51 = vpack.c.bf16 %v92_v44, %v90_v43  ;;  %v274_v41 = vlaneseq }
  0x29   :  { %1398 = vmatpush1.bf16.msra.mxu0 %v1397_v27  ;;  %1448 = vmatprep.subr.bf16.mxu1 %v1447_v36  ;;  %v378_v50 = vld [vmem:[%s2385_s8 + $0x58] sm:$0xff]  ;;  %v1407_v52 = vpack.c.bf16 %v97_v46, %v95_v45  ;;  %v94_v53 = vld [vmem:[%s2382_s5 + $0x140] sm:$0xff]  ;;  %v96_v55 = vld [vmem:[%s2382_s5 + $0x150] sm:$0xff] }
  0x2a   :  { %1400 = vmatprep.subr.bf16.mxu0 %v1399_v30  ;;  %v99_v56 = vld [vmem:[%s2382_s5 + $0x168] sm:$0xff]  ;;  %v101_v57 = vld [vmem:[%s2382_s5 + $0x178] sm:$0xff]  ;;  %v1453_v58 = vpack.c.bf16 %v378_v50, %v377_v49  ;;  %v1409_v59 = vpack.c.bf16 %v96_v55, %v94_v53  ;;  %v98_v61 = vld [vmem:[%s2382_s5 + $0x160] sm:$0xff] }
  0x2b   :  { %v1411_v60 = vpack.c.bf16 %v101_v57, %v99_v56  ;;  %v100_v62 = vld [vmem:[%s2382_s5 + $0x170] sm:$0xff]  ;;  %v103_v63 = vld [vmem:[%s2382_s5 + $0x188] sm:$0xff]  ;;  %v105_v0 = vld [vmem:[%s2382_s5 + $0x198] sm:$0xff] }
  0x2c   :  { %1450 = vmatpush3.bf16.msra.mxu1 %v1449_v47  ;;  %v1413_v1 = vpack.c.bf16 %v100_v62, %v98_v61  ;;  %v1415_v2 = vpack.c.bf16 %v105_v0, %v103_v63  ;;  %v102_v3 = vld [vmem:[%s2382_s5 + $0x180] sm:$0xff]  ;;  %v104_v4 = vld [vmem:[%s2382_s5 + $0x190] sm:$0xff]  ;;  %v107_v5 = vld [vmem:[%s2382_s5 + $0x1a8] sm:$0xff] }
  0x2d   :  { %1402 = vmatpush1.bf16.msra.mxu0 %v1401_v39  ;;  %1452 = vmatprep.subr.bf16.mxu1 %v1451_v48  ;;  %v109_v6 = vld [vmem:[%s2382_s5 + $0x1b8] sm:$0xff]  ;;  %v1417_v8 = vpack.c.bf16 %v104_v4, %v102_v3  ;;  %v106_v10 = vld [vmem:[%s2382_s5 + $0x1a0] sm:$0xff]  ;;  %v108_v11 = vld [vmem:[%s2382_s5 + $0x1b0] sm:$0xff] }
  0x2e   :  { %1404 = vmatprep.subr.bf16.mxu0 %v1403_v42  ;;  %v1419_v9 = vpack.c.bf16 %v109_v6, %v107_v5  ;;  %v111_v12 = vld [vmem:[%s2382_s5 + $0x1c8] sm:$0xff]  ;;  %v113_v13 = vld [vmem:[%s2382_s5 + $0x1d8] sm:$0xff]  ;;  %v1421_v14 = vpack.c.bf16 %v108_v11, %v106_v10  ;;  %v110_v16 = vld [vmem:[%s2382_s5 + $0x1c0] sm:$0xff]  ;;  %v2029_v42 = vshrl.u32 %v274_v41, 7 }
  0x2f   :  { %v1423_v15 = vpack.c.bf16 %v113_v13, %v111_v12  ;;  %v112_v17 = vld [vmem:[%s2382_s5 + $0x1d0] sm:$0xff]  ;;  %v115_v18 = vld [vmem:[%s2382_s5 + $0x1e8] sm:$0xff]  ;;  %v117_v19 = vld [vmem:[%s2382_s5 + $0x1f8] sm:$0xff] }
  0x30   :  { %1454 = vmatpush3.bf16.msra.mxu1 %v1453_v58  ;;  %v1425_v20 = vpack.c.bf16 %v112_v17, %v110_v16  ;;  %v1427_v21 = vpack.c.bf16 %v117_v19, %v115_v18  ;;  %v114_v22 = vld [vmem:[%s2382_s5 + $0x1e0] sm:$0xff]  ;;  %v116_v23 = vld [vmem:[%s2382_s5 + $0x1f0] sm:$0xff]  ;;  %v396_v27 = vld [vmem:[%s2385_s8 + $0xe8] sm:$0xff]  ;;  %v276_v43 = vsub.s32 0, %v2029_v42  ;;  %v280_v45 = vsub.s32 1, %v2029_v42  ;;  %s1589_s5 = scalar_lea.vmem %s1189_s4, 128 }
  0x31   :  { %1406 = vmatpush1.bf16.msra.mxu0 %v1405_v51  ;;  %v1429_v24 = vpack.c.bf16 %v116_v23, %v114_v22  ;;  %v46_v25 = vld [vmem:[%s2378_s1] sm:$0xff]  ;;  %v380_v30 = vld [vmem:[%s2385_s8 + $0x68] sm:$0xff]  ;;  %v397_v32 = vld [vmem:[%s2385_s8 + $0xf0] sm:$0xff]  ;;  %vm1152_vm5 = vcmp.lt.s32.totalorder %v2029_v42, 4  ;;  %p1590_p0 = scmp.ne.s32.totalorder %s1189_s4, %s1589_s5  ;;  %p1595_p2 = scmp.lt.s32.totalorder %s1589_s5, %s1589_s5 }
  0x32   :  { %1408 = vmatprep.subr.bf16.mxu0 %v1407_v52  ;;  %v395_v26 = vld [vmem:[%s2385_s8 + $0xe0] sm:$0xff]  ;;  %v398_v33 = vld [vmem:[%s2385_s8 + $0xf8] sm:$0xff]  ;;  %v381_v35 = vld [vmem:[%s2385_s8 + $0x70] sm:$0xff] }
  0x33   :  { %v1455_v28 = vpack.c.bf16 %v396_v27, %v395_v26  ;;  %v379_v29 = vld [vmem:[%s2385_s8 + $0x60] sm:$0xff]  ;;  %v1459_v34 = vpack.c.bf16 %v398_v33, %v397_v32  ;;  %v382_v36 = vld [vmem:[%s2385_s8 + $0x78] sm:$0xff]  ;;  %v470_v55 = vld [vmem:[%s2388_s11 + $0x8] sm:$0xff]  ;;  %p1596_p3 = por %p1595_p2, %p1594_p1 }
  0x34   :  { %v1457_v31 = vpack.c.bf16 %v380_v30, %v379_v29  ;;  %v1461_v37 = vpack.c.bf16 %v382_v36, %v381_v35  ;;  %v272_v44 = vld [vmem:[%s2383_s6] sm:$0x3]  ;;  %v472_v61 = vld [vmem:[%s2388_s11 + $0x18] sm:$0xff]  ;;  %v586_v63 = vld [vmem:[%s2386_s9 + $0x8] sm:$0xff]  ;;  %v569_v30 = vmax.f32 %v1811_v54, 0.0 }
  0x35   :  { %1410 = vmatpush1.bf16.msra.mxu0 %v1409_v59  ;;  %1456 = vmatprep.subr.bf16.mxu1 %v1455_v28  ;;  %v277_v46 = vrot.slane %v272_v44, %v276_v43  ;;  %v281_v47 = vrot.slane %v272_v44, %v280_v45  ;;  %v469_v53 = vld [vmem:[%s2388_s11] sm:$0xff]  ;;  %v591_v0 = vld [vmem:[%s2386_s9 + $0x30] sm:$0xff]  ;;  %v590_v3 = vld [vmem:[%s2386_s9 + $0x28] sm:$0xff]  ;;  %p1597_p4 = pnand %p1596_p3, %p1590_p0 }
  0x36   :  { %1412 = vmatprep.subr.bf16.mxu0 %v1411_v60  ;;  %1458 = vmatpush3.bf16.msra.mxu1 %v1457_v31  ;;  %v1464_v59 = vpack.c.bf16 %v470_v55, %v469_v53  ;;  %v471_v60 = vld [vmem:[%s2388_s11 + $0x10] sm:$0xff]  ;;  %v596_v4 = vld [vmem:[%s2386_s9 + $0x58] sm:$0xff]  ;;  %v601_v5 = vld [vmem:[%s2386_s9 + $0x80] sm:$0xff] }
  0x37   :  { %1460 = vmatprep.subr.bf16.mxu1 %v1459_v34  ;;  %v1467_v62 = vpack.c.bf16 %v472_v61, %v471_v60  ;;  %v1473_v11 = vpack.c.bf16 %v601_v5, %v596_v4  ;;  %v595_v12 = vld [vmem:[%s2386_s9 + $0x50] sm:$0xff]  ;;  %v600_v13 = vld [vmem:[%s2386_s9 + $0x78] sm:$0xff]  ;;  %v593_v19 = vld [vmem:[%s2386_s9 + $0x40] sm:$0xff] }
  0x38   :  { %v588_v18 = vld [vmem:[%s2386_s9 + $0x18] sm:$0xff]  ;;  %v587_v34 = vld [vmem:[%s2386_s9 + $0x10] sm:$0xff]  ;;  %v1198_v36 = vld [vmem:[%s2389_s12] ss:$0 sm:$0xff] }
  0x39   :  { %1414 = vmatpush1.bf16.msra.mxu0 %v1413_v1  ;;  %v1469_v1 = vpack.c.bf16 %v591_v0, %v586_v63  ;;  %v592_v35 = vld [vmem:[%s2386_s9 + $0x38] sm:$0xff] }
  0x3a   :  { %1416 = vmatprep.subr.bf16.mxu0 %v1415_v2  ;;  %1462 = vmatpush3.bf16.msra.mxu1 %v1461_v37  ;;  %v585_v2 = vld [vmem:[%s2386_s9] sm:$0xff]  ;;  %v598_v37 = vld [vmem:[%s2386_s9 + $0x68] sm:$0xff]  ;;  %v1479_v41 = vpack.c.bf16 %v592_v35, %v587_v34  ;;  %v881_v35 = vld [vmem:[%s2387_s10 + $0x198] sm:$0xff] }
  0x3b   :  { %1463 = vmatprep.subr.bf16.mxu1 %v1614_v38 }
  0x3d   :  { %1418 = vmatpush1.bf16.msra.mxu0 %v1417_v8 }
  0x3e   :  { %1420 = vmatprep.subr.bf16.mxu0 %v1419_v9  ;;  %v1471_v9 = vpack.c.bf16 %v590_v3, %v585_v2 }
  0x41   :  { %1422 = vmatpush1.bf16.msra.mxu0 %v1421_v14  ;;  %v1475_v14 = vpack.c.bf16 %v600_v13, %v595_v12  ;;  %v831_v12 = vld [vmem:[%s2387_s10 + $0x8] sm:$0xff] }
  0x42   :  { %1424 = vmatprep.subr.bf16.mxu0 %v1423_v15  ;;  %v570_v15 = vand.u32 2147483647, %v1811_v54 }
  0x44   :  { %v571_v16 = vsub.f32 0.0, %v570_v15  ;;  %v849_v15 = vld [vmem:[%s2387_s10 + $0x98] sm:$0xff] }
  0x45   :  { %1426 = vmatpush1.bf16.msra.mxu0 %v1425_v20  ;;  %v1477_v20 = vpack.c.bf16 %v593_v19, %v588_v18  ;;  %v833_v18 = vld [vmem:[%s2387_s10 + $0x18] sm:$0xff] }
  0x46   :  { %1428 = vmatprep.subr.bf16.mxu0 %v1427_v21  ;;  %v572_v17 = vmul.f32 1.442695, %v571_v16 }
  0x48   :  { %1575 = vpow2.f32 %v572_v17  ;;  %v832_v17 = vld [vmem:[%s2387_s10 + $0x10] sm:$0xff] }
  0x49   :  { %1430 = vmatpush1.bf16.msra.mxu0 %v1429_v24  ;;  %v1497_v19 = vpack.c.bf16 %v833_v18, %v832_v17 }
  0x4c   :  { %266 = vmatmul.mubr.f32.vlgmr.msra.gmra.mrb[0].mxu0 %v46_v25  ;;  %v1616_v25 = vmov 32  }
  0x4d   :  { %1574 = vset.pattern.permute.xlu1 %v1616_v25  ;;  %1573 = vset.pattern.permute.xlu0 %v1616_v25  ;;  %v862_v25 = vld [vmem:[%s2387_s10 + $0x100] sm:$0xff] }
  0x52   :  { %v1576_v21 = vpop.eup %1575 }
  0x53   :  { %v574_v22 = vadd.f32 1.0, %v1576_v21  ;;  %v577_v23 = vmul.f32 -0.5, %v1576_v21  ;;  %v580_v27 = vand.u32 2147483647, %v1576_v21 }
  0x55   :  { %1577 = vlog2.f32 %v574_v22  ;;  %v578_v24 = vadd.f32 1.0, %v577_v23  ;;  %vm581_vm3 = vcmp.lt.f32.partialorder %v580_v27, 0.0004427343  ;;  %v850_v22 = vld [vmem:[%s2387_s10 + $0xa0] sm:$0xff] }
  0x57   :  { %v579_v29 = vmul.f32 %v1576_v21, %v578_v24  ;;  %v879_v21 = vld [vmem:[%s2387_s10 + $0x188] sm:$0xff] }
  0x58   :  { %v851_v24 = vld [vmem:[%s2387_s10 + $0xa8] sm:$0xff] }
  0x59   :  { %v1499_v27 = vpack.c.bf16 %v851_v24, %v850_v22  ;;  %v888_v22 = vld [vmem:[%s2387_s10 + $0x1d0] sm:$0xff] }
  0x5f   :  { %v1578_v26 = vpop.eup %1577 }
  0x60   :  { %v576_v28 = vmul.f32 0.6931472, %v1578_v26  ;;  %v863_v26 = vld [vmem:[%s2387_s10 + $0x108] sm:$0xff] }
  0x62   :  { %v582_v31 = vsel %vm581_vm3, %v579_v29, %v576_v28  ;;  %v1525_v28 = vpack.c.bf16 %v863_v26, %v862_v25  ;;  %v834_v29 = vld [vmem:[%s2387_s10 + $0x20] sm:$0xff]  ;;  %v860_v25 = vld [vmem:[%s2387_s10 + $0xf0] sm:$0xff]  ;;  %v861_v26 = vld [vmem:[%s2387_s10 + $0xf8] sm:$0xff] }
  0x63   :  { %v2085_v32 = vadd.f32 %v582_v31, %v569_v30  ;;  %v835_v30 = vld [vmem:[%s2387_s10 + $0x28] sm:$0xff]  ;;  %v880_v31 = vld [vmem:[%s2387_s10 + $0x190] sm:$0xff] }
  0x64   :  { %v1501_v34 = vpack.c.bf16 %v835_v30, %v834_v29  ;;  %v873_v29 = vld [vmem:[%s2387_s10 + $0x158] sm:$0xff]  ;;  %v844_v30 = vld [vmem:[%s2387_s10 + $0x70] sm:$0xff] }
  0x65   :  { %1579 = vrcp.f32 %v2085_v32 }
  0x6f   :  { %v2088_v33 = vpop.eup %1579 }
  0x70   :  { %1130 = vrot.lane.b32.xlu0 %v2088_v33, %s1617_s26 }
  0xe4   :  { %v360_v39 = vpop.f32.mrb[0].mxu1 }
  0xe5   :  { %v362_v40 = vpop.f32.mrb[1].mxu1 }
 0x11f   :  { %v267_v48 = vpop.f32.mrb[0].mxu0 }
 0x120   :  { %v284_v49 = vadd.f32 %v277_v46, %v267_v48  ;;  %v269_v50 = vpop.f32.mrb[1].mxu0  ;;  %v597_v46 = vld [vmem:[%s2386_s9 + $0x60] sm:$0xff] }
 0x121   :  { %v285_v51 = vadd.f32 %v281_v47, %v269_v50  ;;  %v602_v47 = vld [vmem:[%s2386_s9 + $0x88] sm:$0xff] }
 0x122   :  { %v286_v52 = vmax.f32 %v284_v49, 0.0  ;;  %v1483_v49 = vpack.c.bf16 %v602_v47, %v597_v46  ;;  %v837_v46 = vld [vmem:[%s2387_s10 + $0x38] sm:$0xff]  ;;  %v882_v47 = vld [vmem:[%s2387_s10 + $0x1a0] sm:$0xff] }
 0x123   :  { %v287_v56 = vmax.f32 %v285_v51, 0.0  ;;  %v589_v51 = vld [vmem:[%s2386_s9 + $0x20] sm:$0xff] }
 0x124   :  { %v365_v57 = vmul.f32 %v360_v39, %v286_v52  ;;  %v603_v39 = vld [vmem:[%s2386_s9 + $0x90] sm:$0xff]  ;;  %v594_v52 = vld [vmem:[%s2386_s9 + $0x48] sm:$0xff] }
 0x125   :  { %v366_v58 = vmul.f32 %v362_v40, %v287_v56  ;;  %v1481_v45 = vpack.c.bf16 %v603_v39, %v598_v37  ;;  %v1486_v55 = vpack.c.bf16 %v594_v52, %v589_v51  ;;  %v599_v56 = vld [vmem:[%s2386_s9 + $0x70] sm:$0xff]  ;;  %v853_v37 = vld [vmem:[%s2387_s10 + $0xb8] sm:$0xff]  ;;  %v1527_v39 = vpack.c.bf16 %v881_v35, %v880_v31  ;;  %v854_v51 = vld [vmem:[%s2387_s10 + $0xc0] sm:$0xff] }
 0x126   :  { %v855_v52 = vld [vmem:[%s2387_s10 + $0xc8] sm:$0xff] }
 0x127   :  { %463 = vmatprep.mubr.f32.mxu1 %v366_v58 }
 0x128   :  { %464 = vmatmul.mubr.f32.vlgmr.msra.gmra.mrb[2].mxu1 %v365_v57  ;;  %v604_v57 = vld [vmem:[%s2386_s9 + $0x98] sm:$0xff] }
 0x129   :  { %1465 = vmatpush3.bf16.msra.mxu1 %v1464_v59  ;;  %1334 = vmatprep.mubr.msk.f32.mxu1 %vm1615_vm2, %v1613_v7  ;;  %v1489_v58 = vpack.c.bf16 %v604_v57, %v599_v56  ;;  %v867_v56 = vld [vmem:[%s2387_s10 + $0x128] sm:$0xff]  ;;  %v838_v57 = vld [vmem:[%s2387_s10 + $0x40] sm:$0xff] }
 0x12a   :  { %1466 = vmatprep.subr.bf16.mxu1 %v1614_v38 }
 0x12d   :  { %1468 = vmatpush3.bf16.msra.mxu1 %v1467_v62 }
 0x12e   :  { %1470 = vmatprep.subr.bf16.mxu1 %v1469_v1 }
 0x1fb   :  { %v1238_v6 = vpop.f32.mrb[2].mxu1 }
 0x1fc   :  { %v1239_v8 = vpop.f32.mrb[3].mxu1 }
 0x1fd   :  { %v1240_v10 = vadd.f32 %v1239_v8, %v1238_v6  ;;  %v846_v8 = vld [vmem:[%s2387_s10 + $0x80] sm:$0xff] }
 0x1ff   :  { %1335 = vmatmul.mubr.msk.f32.vlgmr.msra.gmra.mrb[4].mxu1 %vm126_vm0, %v1240_v10 }
 0x200   :  { %1472 = vmatpush1.bf16.msra.mxu1 %v1471_v9  ;;  %672 = vmatprep.mubr.f32.mxu1 %v1613_v7  ;;  %v847_v9 = vld [vmem:[%s2387_s10 + $0x88] sm:$0xff] }
 0x201   :  { %1474 = vmatprep.subr.bf16.mxu1 %v1473_v11  ;;  %v1491_v10 = vpack.c.bf16 %v847_v9, %v846_v8  ;;  %v830_v11 = vld [vmem:[%s2387_s10] sm:$0xff]  ;;  %v887_v9 = vld [vmem:[%s2387_s10 + $0x1c8] sm:$0xff] }
 0x202   :  { %v1493_v13 = vpack.c.bf16 %v831_v12, %v830_v11  ;;  %v886_v8 = vld [vmem:[%s2387_s10 + $0x1c0] sm:$0xff]  ;;  %v859_v11 = vld [vmem:[%s2387_s10 + $0xe8] sm:$0xff] }
 0x204   :  { %1476 = vmatpush1.bf16.msra.mxu1 %v1475_v14  ;;  %v848_v14 = vld [vmem:[%s2387_s10 + $0x90] sm:$0xff] }
 0x205   :  { %1478 = vmatprep.subr.bf16.mxu1 %v1477_v20  ;;  %v1495_v16 = vpack.c.bf16 %v849_v15, %v848_v14  ;;  %v878_v20 = vld [vmem:[%s2387_s10 + $0x180] sm:$0xff]  ;;  %v1539_v14 = vpack.c.bf16 %v887_v9, %v886_v8 }
 0x206   :  { %v1523_v23 = vpack.c.bf16 %v879_v21, %v878_v20  ;;  %v870_v15 = vld [vmem:[%s2387_s10 + $0x140] sm:$0xff]  ;;  %v843_v20 = vld [vmem:[%s2387_s10 + $0x68] sm:$0xff] }
 0x208   :  { %1524 = vmatprep.subr.bf16.mxu0 %v1523_v23  ;;  %v889_v23 = vld [vmem:[%s2387_s10 + $0x1d8] sm:$0xff] }
 0x209   :  { %1526 = vmatpush3.bf16.msra.mxu0 %v1525_v28  ;;  %v1543_v24 = vpack.c.bf16 %v889_v23, %v888_v22  ;;  %v1519_v28 = vpack.c.bf16 %v861_v26, %v860_v25 }
 0x20a   :  { %1528 = vmatprep.subr.bf16.mxu0 %v1527_v39 }
 0x2d2   :  { %v549_v40 = vpop.f32.mrb[4].mxu1 }
 0x2d3   :  { %v550_v43 = vadd.f32 %v1198_v36, %v549_v40  ;;  %v1336_v44 = vpop.f32.mrb[5].mxu1  ;;  %v852_v36 = vld [vmem:[%s2387_s10 + $0xb0] sm:$0xff] }
 0x2d4   :  { %v1503_v40 = vpack.c.bf16 %v853_v37, %v852_v36  ;;  %v836_v44 = vld [vmem:[%s2387_s10 + $0x30] sm:$0xff]  ;;  %v890_v36 = vld [vmem:[%s2387_s10 + $0x1e0] sm:$0xff]  ;;  %v891_v37 = vld [vmem:[%s2387_s10 + $0x1e8] sm:$0xff] }
 0x2d5   :  { %v554_v48 = vand.u32 2147483647, %v550_v43  ;;  %1200 = vmatmul.mubr.msk.f32.vlgmr.msra.gmra.mrb[6].mxu1 %vm126_vm0, %v550_v43  ;;  %v553_v3 = vmax.f32 %v550_v43, 0.0  ;;  %v1547_v39 = vpack.c.bf16 %v891_v37, %v890_v36 }
 0x2d6   :  { %1480 = vmatpush1.bf16.msra.mxu1 %v1479_v41  ;;  %743 = vmatprep.mubr.f32.mxu1 %v1613_v7  ;;  %v864_v41 = vld [vmem:[%s2387_s10 + $0x110] sm:$0xff] }
 0x2d7   :  { %v555_v50 = vsub.f32 0.0, %v554_v48  ;;  %1482 = vmatprep.subr.bf16.mxu1 %v1481_v45  ;;  %v883_v48 = vld [vmem:[%s2387_s10 + $0x1a8] sm:$0xff] }
 0x2d9   :  { %v556_v53 = vmul.f32 1.442695, %v555_v50  ;;  %v1531_v50 = vpack.c.bf16 %v883_v48, %v882_v47  ;;  %v876_v47 = vld [vmem:[%s2387_s10 + $0x170] sm:$0xff]  ;;  %v877_v48 = vld [vmem:[%s2387_s10 + $0x178] sm:$0xff] }
 0x2da   :  { %1484 = vmatpush1.bf16.msra.mxu1 %v1483_v49  ;;  %v1505_v49 = vpack.c.bf16 %v837_v46, %v836_v44  ;;  %v892_v44 = vld [vmem:[%s2387_s10 + $0x1f0] sm:$0xff] }
 0x2db   :  { %1581 = vpow2.f32 %v556_v53  ;;  %1485 = vmatprep.subr.bf16.mxu1 %v1614_v38  ;;  %v866_v53 = vld [vmem:[%s2387_s10 + $0x120] sm:$0xff] }
 0x2dd   :  { %1201 = vmatmul.mubr.msk.f32.vlgmr.msra.gmra.mrb[8].mxu1 %vm126_vm0, %v550_v43 }
 0x2de   :  { %1487 = vmatpush3.bf16.msra.mxu1 %v1486_v55  ;;  %1345 = vmatprep.mubr.msk.f32.mxu1 %vm1615_vm2, %v1613_v7  ;;  %v1507_v55 = vpack.c.bf16 %v855_v52, %v854_v51  ;;  %v50_v51 = vld [vmem:[%s2380_s3 + $0x8] sm:$0xff] }
 0x2df   :  { %1488 = vmatprep.subr.bf16.mxu1 %v1614_v38 }
 0x2e2   :  { %1490 = vmatpush3.bf16.msra.mxu1 %v1489_v58  ;;  %v839_v58 = vld [vmem:[%s2387_s10 + $0x48] sm:$0xff] }
 0x2e3   :  { %1492 = vmatprep.subr.bf16.mxu1 %v1491_v10  ;;  %v858_v10 = vld [vmem:[%s2387_s10 + $0xe0] sm:$0xff] }
 0x2e4   :  { %v1515_v17 = vpack.c.bf16 %v859_v11, %v858_v10  ;;  %v53_v10 = vld [vmem:[%s2380_s3 + $0x20] sm:$0xff] }
 0x2e5   :  { %v1582_v59 = vpop.eup %1581  ;;  %1346 = vmatmul.mubr.msk.f32.vlgmr.msra.gmra.mrb[10].mxu1 %vm126_vm0, %v550_v43  ;;  %v865_v43 = vld [vmem:[%s2387_s10 + $0x118] sm:$0xff] }
 0x2e6   :  { %v558_v60 = vadd.f32 1.0, %v1582_v59  ;;  %v561_v61 = vmul.f32 -0.5, %v1582_v59  ;;  %v564_v63 = vand.u32 2147483647, %v1582_v59  ;;  %1494 = vmatpush3.bf16.msra.mxu1 %v1493_v13  ;;  %v1529_v45 = vpack.c.bf16 %v865_v43, %v864_v41  ;;  %v875_v41 = vld [vmem:[%s2387_s10 + $0x168] sm:$0xff] }
 0x2e7   :  { %1496 = vmatprep.subr.bf16.mxu1 %v1495_v16  ;;  %v871_v16 = vld [vmem:[%s2387_s10 + $0x148] sm:$0xff] }
 0x2e8   :  { %1583 = vlog2.f32 %v558_v60  ;;  %v562_v62 = vadd.f32 1.0, %v561_v61  ;;  %vm565_vm4 = vcmp.lt.f32.partialorder %v564_v63, 0.0004427343  ;;  %1530 = vmatpush3.bf16.msra.mxu0 %v1529_v45  ;;  %v884_v60 = vld [vmem:[%s2387_s10 + $0x1b0] sm:$0xff]  ;;  %v885_v61 = vld [vmem:[%s2387_s10 + $0x1b8] sm:$0xff]  ;;  %v1509_v63 = vpack.c.bf16 %v839_v58, %v838_v57  ;;  %v895_v57 = vld [vmem:[%s2387_s10 + $0x208] sm:$0xff] }
 0x2e9   :  { %1532 = vmatprep.subr.bf16.mxu0 %v1531_v50  ;;  %v1541_v18 = vpack.c.bf16 %v871_v16, %v870_v15  ;;  %v893_v45 = vld [vmem:[%s2387_s10 + $0x1f8] sm:$0xff]  ;;  %v49_v50 = vld [vmem:[%s2380_s3] sm:$0xff] }
 0x2ea   :  { %v563_v2 = vmul.f32 %v1582_v59, %v562_v62  ;;  %1498 = vmatpush3.bf16.msra.mxu1 %v1497_v19  ;;  %v1533_v59 = vpack.c.bf16 %v867_v56, %v866_v53  ;;  %v856_v62 = vld [vmem:[%s2387_s10 + $0xd0] sm:$0xff]  ;;  %v842_v19 = vld [vmem:[%s2387_s10 + $0x60] sm:$0xff]  ;;  %v1551_v46 = vpack.c.bf16 %v893_v45, %v892_v44 }
 0x2eb   :  { %1500 = vmatprep.subr.bf16.mxu1 %v1499_v27  ;;  %v1517_v21 = vpack.c.bf16 %v843_v20, %v842_v19  ;;  %v872_v27 = vld [vmem:[%s2387_s10 + $0x150] sm:$0xff]  ;;  %v894_v56 = vld [vmem:[%s2387_s10 + $0x200] sm:$0xff] }
 0x2ec   :  { %1534 = vmatpush3.bf16.msra.mxu0 %v1533_v59  ;;  %v1545_v31 = vpack.c.bf16 %v873_v29, %v872_v27 }
 0x2ee   :  { %1502 = vmatpush3.bf16.msra.mxu1 %v1501_v34  ;;  %v845_v34 = vld [vmem:[%s2387_s10 + $0x78] sm:$0xff] }
 0x2ef   :  { %1504 = vmatprep.subr.bf16.mxu1 %v1503_v40  ;;  %v1521_v35 = vpack.c.bf16 %v845_v34, %v844_v30  ;;  %v874_v40 = vld [vmem:[%s2387_s10 + $0x160] sm:$0xff] }
 0x2f0   :  { %v1549_v43 = vpack.c.bf16 %v875_v41, %v874_v40 }
 0x2f2   :  { %v1584_v0 = vpop.eup %1583  ;;  %1506 = vmatpush3.bf16.msra.mxu1 %v1505_v49  ;;  %v1553_v49 = vpack.c.bf16 %v877_v48, %v876_v47 }
 0x2f3   :  { %v560_v1 = vmul.f32 0.6931472, %v1584_v0  ;;  %v1535_v0 = vpack.c.bf16 %v885_v61, %v884_v60  ;;  %1508 = vmatprep.subr.bf16.mxu1 %v1507_v55  ;;  %v1556_v60 = vpack.c.bf16 %v895_v57, %v894_v56 }
 0x2f5   :  { %v566_v4 = vsel %vm565_vm4, %v563_v2, %v560_v1  ;;  %v857_v1 = vld [vmem:[%s2387_s10 + $0xd8] sm:$0xff]  ;;  %v868_v2 = vld [vmem:[%s2387_s10 + $0x130] sm:$0xff]  ;;  %1536 = vmatprep.subr.bf16.mxu0 %v1535_v0 }
 0x2f6   :  { %v567_v5 = vadd.f32 %v566_v4, %v553_v3  ;;  %v869_v3 = vld [vmem:[%s2387_s10 + $0x138] sm:$0xff]  ;;  %v1511_v4 = vpack.c.bf16 %v857_v1, %v856_v62  ;;  %1510 = vmatpush3.bf16.msra.mxu1 %v1509_v63  ;;  %v896_v62 = vld [vmem:[%s2387_s10 + $0x210] sm:$0xff] }
 0x2f7   :  { %v1537_v12 = vpack.c.bf16 %v869_v3, %v868_v2  ;;  %v897_v63 = vld [vmem:[%s2387_s10 + $0x218] sm:$0xff]  ;;  %v51_v0 = vld [vmem:[%s2380_s3 + $0x10] sm:$0xff] }
 0x2f8   :  { %1123 = vperm.xlu1 %1574, %v567_v5   ;;  %1585 = vrcp.f32 %v567_v5  ;;  %v840_v5 = vld [vmem:[%s2387_s10 + $0x50] sm:$0xff]  ;;  %1512 = vmatprep.subr.bf16.mxu1 %v1511_v4  ;;  %v52_v1 = vld [vmem:[%s2380_s3 + $0x18] sm:$0xff]  ;;  %v1559_v3 = vpack.c.bf16 %v897_v63, %v896_v62  ;;  %s1618_s3 = smov 8  }
 0x2f9   :  { %1538 = vmatpush3.bf16.msra.mxu0 %v1537_v12 }
 0x2fa   :  { %1540 = vmatprep.subr.bf16.mxu0 %v1539_v14 }
 0x2fd   :  { %1542 = vmatpush3.bf16.msra.mxu0 %v1541_v18 }
 0x2fe   :  { %1544 = vmatprep.subr.bf16.mxu0 %v1543_v24  ;;  %v1131_v24 = vpop.permute.xlu0 %1130 }
 0x301   :  { %1546 = vmatpush3.bf16.msra.mxu0 %v1545_v31 }
 0x302   :  { %v1586_v6 = vpop.eup %1585  ;;  %1548 = vmatprep.subr.bf16.mxu0 %v1547_v39 }
 0x303   :  { %1113 = vperm.xlu0 %1573, %v1586_v6   ;;  %v841_v6 = vld [vmem:[%s2387_s10 + $0x58] sm:$0xff] }
 0x304   :  { %v1513_v13 = vpack.c.bf16 %v841_v6, %v840_v5 }
 0x305   :  { %1550 = vmatpush3.bf16.msra.mxu0 %v1549_v43 }
 0x306   :  { %1514 = vmatpush3.bf16.msra.mxu1 %v1513_v13  ;;  %1552 = vmatprep.subr.bf16.mxu0 %v1551_v46 }
 0x307   :  { %1516 = vmatprep.subr.bf16.mxu1 %v1515_v17 }
 0x309   :  { %1554 = vmatpush3.bf16.msra.mxu0 %v1553_v49 }
 0x30a   :  { %1518 = vmatpush3.bf16.msra.mxu1 %v1517_v21 }
 0x30b   :  { %1520 = vmatprep.subr.bf16.mxu1 %v1519_v28 }
 0x30e   :  { %1522 = vmatpush3.bf16.msra.mxu1 %v1521_v35 }
 0x30f   :  { %1555 = vmatprep.subr.bf16.mxu1 %v1614_v38 }
 0x377   :  { %v1124_v31 = vpop.permute.xlu1 %1123 }
 0x378   :  { %v1126_v35 = vmul.f32 %v2088_v33, %v1124_v31  ;;  %v1205_v33 = vsel %vm1152_vm5, 1.0, %v1613_v7 }
 0x382   :  { %v1114_v26 = vpop.permute.xlu0 %1113 }
 0x383   :  { %v1116_v27 = vmul.f32 %v1114_v26, %v2085_v32 }
 0x385   :  { %v1117_v28 = vadd.f32 1e-08, %v1116_v27 }
 0x387   :  { %1587 = vlog2.f32 %v1117_v28 }
 0x391   :  { %v1588_v29 = vpop.eup %1587 }
 0x392   :  { %v1119_v30 = vmul.f32 0.6931472, %v1588_v29 }
 0x394   :  { %v1204_v34 = vadd.f32 -1.0, %v1119_v30 }
 0x396   :  { %v1127_v36 = vadd.f32 %v1204_v34, %v1126_v35 }
 0x398   :  { %v1128_v37 = vmul.f32 32.0, %v1127_v36 }
 0x3a8   :  { %v674_v52 = vpop.f32.mrb[6].mxu1 }
 0x3a9   :  { %v820_v53 = vsub.f32 %v49_v50, %v674_v52  ;;  %v676_v55 = vpop.f32.mrb[7].mxu1 }
 0x3aa   :  { %v821_v58 = vsub.f32 %v50_v51, %v676_v55 }
 0x3ab   :  { %v825_v61 = vmul.f32 %v820_v53, %v820_v53 }
 0x3ac   :  { %v826_v59 = vmul.f32 %v821_v58, %v821_v58 }
 0x3ae   :  { %965 = vmatprep.mubr.f32.mxu1 %v826_v59 }
 0x3af   :  { %966 = vmatmul.mubr.f32.vlgmr.msra.gmra.mrb[12].mxu1 %v825_v61 }
 0x3b0   :  { %v745_v2 = vpop.f32.mrb[8].mxu1  ;;  %1557 = vmatpush3.bf16.msra.mxu1 %v1556_v60  ;;  %1356 = vmatprep.mubr.msk.f32.mxu1 %vm1615_vm2, %v1613_v7 }
 0x3b1   :  { %v822_v4 = vsub.f32 %v51_v0, %v745_v2  ;;  %v747_v5 = vpop.f32.mrb[9].mxu1  ;;  %1558 = vmatprep.subr.bf16.mxu1 %v1614_v38 }
 0x3b2   :  { %v823_v6 = vsub.f32 %v52_v1, %v747_v5 }
 0x3b3   :  { %v827_v9 = vmul.f32 %v822_v4, %v822_v4 }
 0x3b4   :  { %v828_v8 = vmul.f32 %v823_v6, %v823_v6  ;;  %1560 = vmatpush3.bf16.msra.mxu1 %v1559_v3 }
 0x3b6   :  { %1035 = vmatprep.mubr.f32.mxu0 %v828_v8 }
 0x3b7   :  { %1036 = vmatmul.mubr.f32.vlgmr.msra.gmra.mrb[2].mxu0 %v827_v9 }
 0x3b8   :  { %v816_v11 = vpop.f32.mrb[10].mxu1 }
 0x3b9   :  { %v824_v12 = vsub.f32 %v53_v10, %v816_v11  ;;  %v1347_v13 = vpop.f32.mrb[11].mxu1 }
 0x3bb   :  { %v829_v14 = vmul.f32 %v824_v12, %v824_v12 }
 0x3bd   :  { %1357 = vmatmul.mubr.msk.f32.vlgmr.msra.gmra.mrb[14].mxu1 %vm126_vm0, %v829_v14 }
 0x482   :  { %v1283_v15 = vpop.f32.mrb[12].mxu1 }
 0x483   :  { %v1284_v16 = vpop.f32.mrb[13].mxu1 }
 0x484   :  { %v1285_v17 = vadd.f32 %v1284_v16, %v1283_v15 }
 0x48a   :  { %v1318_v38 = vpop.f32.mrb[2].mxu0 }
 0x48b   :  { %v1319_v18 = vpop.f32.mrb[3].mxu0 }
 0x48c   :  { %v1320_v19 = vadd.f32 %v1319_v18, %v1318_v38 }
 0x48e   :  { %v1038_v20 = vadd.f32 %v1320_v19, %v1285_v17 }
 0x490   :  { %v1107_v21 = vpop.f32.mrb[14].mxu1 }
 0x491   :  { %v1108_v22 = vadd.f32 %v1107_v21, %v1038_v20  ;;  %v1358_v23 = vpop.f32.mrb[15].mxu1 }
 0x493   :  { %v1133_v25 = vmul.f32 %v1131_v24, %v1108_v22 }
 0x495   :  { %1135 = vrot.lane.b32.xlu1 %v1133_v25, %s1618_s3 }
 0x507   :  { %v1136_v39 = vpop.permute.xlu1 %1135 }
 0x508   :  { %v1138_v40 = vadd.f32 %v1136_v39, %v1128_v37 }
 0x50a   :  { %v1139_v41 = vmul.f32 0.5, %v1138_v40 }
 0x50c   :  { %1141 = vrot.lane.b32.xlu1 %v1139_v41, %s1617_s26 }
 0x57e   :  { %v1142_v43 = vpop.permute.xlu1 %1141 }
 0x57f   :  { %v1144_v44 = vsub.f32 %v1139_v41, %v1142_v43 }
 0x581   :  { %v1145_v45 = vadd.f32 1.0, %v1144_v44 }
 0x583   :  { %v1146_v46 = vmax.f32 %v1145_v45, 0.0 }
 0x585   :  { %1156 = vrot.lane.b32.xlu0 %v1146_v46, %s1619_s30 }
 0x5f7   :  { %v1157_v32 = vpop.permute.xlu0 %1156 }
 0x5f8   :  { %v1159_v47 = vmul.f32 %v1157_v32, %v1811_v54 }
 0x5fa   :  { %v1160_v48 = vsel %vm290_vm1, %v1159_v47, 0.0 }
 0x5fb   :  { %1161 = vadd.xlane.f32.xlu1 %v1160_v48 }
 0x688   :  { %v1162_v49 = vpop.xlane.xlu1 %1161 }
 0x689   :  { %v1163_v50 = vadd.f32 %v1162_v49, %v1139_v41 }
 0x68b   :  { %v1164_v51 = vmul.f32 %v1205_v33, %v1163_v50 }
 0x68d   :  { %1166 = vrot.lane.b32.xlu0 %v1164_v51, %s1617_s26 }
 0x6ff   :  { %v1167_v52 = vpop.permute.xlu0 %1166 }
 0x700   :  { %v1170_v53 = vsel %vm1169_vm6, %v1167_v52, 0.0 }
 0x701   :  { %1171 = vadd.xlane.f32.xlu0 %v1170_v53 }
 0x78e   :  { %v1172_v55 = vpop.xlane.xlu0 %1171 }
 0x78f   :  { %v1173_v56 = vrot.slane %v1172_v55, 4 }
 0x791   :  { %v1174_v57 = vadd.f32 %v1173_v56, %v1172_v55 }
 0x793   :  { %v1175_v54 = vrot.slane %v1174_v57, 2 }
 0x795   :  { %v1176_v58 = vadd.f32 %v1175_v54, %v1174_v57 }
 0x797   :  { %v1177_v59 = vrot.slane %v1176_v58, 1 }
 0x799   :  { %v1178_v60 = vadd.f32 %v1177_v59, %v1176_v58 }
 0x79b   :  { %1563 = vpush %v1178_v60 }
 0x7cc   :  { %s1564_s15 = spop %1563 }
 0x7cd   :  { %v1180_v7 = vstv %s1564_s15 }
 0x7ce   :  { %1181 = vst [vmem:[#allocation2] sm:$0xff] %v1180_v7 }
 0x7cf   :  { %1600 = shalt.err (!%p1597_p4)
}
 0x7d0   :  { %s1601_s11 = scalar_lea.hbm %s2390_s13, 128 }
 0x7d1   :  { %p1602_p5 = scmp.ne.s32.totalorder %s2390_s13, %s1601_s11  ;;  %p1605_p6 = scmp.lt.u32.totalorder %s1601_s11, %s2390_s13 }
 0x7d3   :  { %p1607_p7 = pnand %p1605_p6, %p1602_p5 }
 0x7d5   :  { %1610 = shalt.err (!%p1607_p7)
}
 0x7d6   :  { %1191 = dma.vmem_to_hbm [thread:$0]  %s1189_s4, 128, %s2390_s13, [#allocation3]  }
 0x7d7   :  { %1611 = dma.done.wait [#allocation3], 128  }
 0x7d8   :  { %1612 = vsyncadd [#allocation3], 4294967168 }
 0x7d9   :  { %1195 = vsyncpa [#allocation3], 1 }

</bundles_post_ra>
